<compile_context>
chip_gen: v7x
topology: tpu7x:2x2x1
jax: 0.10.0
libtpu: 0.0.40
codegen_flags: <defaults>
</compile_context>

<pallas_src>
import functools
from copy import deepcopy

import jax
import jax.numpy as jnp
from jax import lax
from jax.experimental import pallas as pl
from jax.experimental.pallas import tpu as pltpu


def _round_up(x, m):
    return (x + m - 1) // m * m


def _mxu_tile_prefs():
    # v6e/v7x MXU is 256-wide; v5e is 128-wide.
    try:
        kind = jax.devices()[0].device_kind.lower()
        if "v5" in kind:
            return 128, 128, 512
    except Exception:
        pass
    return 256, 256, 512


_TM_PREF, _TN_PREF, _TK_PREF = _mxu_tile_prefs()


# ----------------------------------------------------------------------------
# Linear forward kernel: y = x @ W^T + b  (torch.nn.Linear semantics)
# ----------------------------------------------------------------------------
def _linear_kernel(x_ref, w_ref, b_ref, o_ref, acc_ref):
    @pl.when(pl.program_id(2) == 0)
    def _init():
        acc_ref[...] = jnp.zeros_like(acc_ref)

    # x block: (tm, tk), w block: (tn, tk) — contract on last dim of both.
    # No in-kernel transpose; Mosaic feeds the MXU directly.
    acc_ref[...] += lax.dot_general(
        x_ref[...], w_ref[...],
        dimension_numbers=(((1,), (1,)), ((), ())),
        preferred_element_type=jnp.float32,
    )

    @pl.when(pl.program_id(2) == pl.num_programs(2) - 1)
    def _finalize():
        o_ref[...] = (acc_ref[...] + b_ref[...].astype(jnp.float32)).astype(o_ref.dtype)


def _linear_forward_impl(x, w, b):
    """x: [B, Din], w: [Dout, Din] (torch layout), b: [Dout] -> [B, Dout]."""
    B, Din = x.shape
    Dout = w.shape[0]

    # Tile sizes: MXU-shaped, clamped to (padded) problem dims.
    tm = min(_TM_PREF, _round_up(B, 8))
    tn = min(_TN_PREF, _round_up(Dout, 128))
    tk = min(_TK_PREF, _round_up(Din, 128))
    B_pad = _round_up(B, tm)
    Dout_pad = _round_up(Dout, tn)
    Din_pad = _round_up(Din, tk)

    # Zero padding on K contributes nothing to the dot product -> exact result.
    x_p = jnp.pad(x, ((0, B_pad - B), (0, Din_pad - Din)))
    w_p = jnp.pad(w, ((0, Dout_pad - Dout), (0, Din_pad - Din)))
    b_p = jnp.pad(b, (0, Dout_pad - Dout)).reshape(1, Dout_pad)

    grid = (B_pad // tm, Dout_pad // tn, Din_pad // tk)

    out = pl.pallas_call(
        _linear_kernel,
        out_shape=jax.ShapeDtypeStruct((B_pad, Dout_pad), x.dtype),
        grid=grid,
        in_specs=[
            pl.BlockSpec((tm, tk), lambda i, j, k: (i, k)),
            pl.BlockSpec((tn, tk), lambda i, j, k: (j, k)),
            pl.BlockSpec((1, tn), lambda i, j, k: (0, j)),
        ],
        out_specs=pl.BlockSpec((tm, tn), lambda i, j, k: (i, j)),
        scratch_shapes=[pltpu.VMEM((tm, tn), jnp.float32)],
        compiler_params=pltpu.CompilerParams(
            dimension_semantics=("parallel", "parallel", "arbitrary"),
            vmem_limit_bytes=48 * 1024 * 1024,  # safe on v7x's 64 MiB VMEM
        ),
    )(x_p, w_p, b_p)
    return out[:B, :Dout]


linear_forward = jax.jit(_linear_forward_impl)


# ----------------------------------------------------------------------------
# Fused EMA update kernel (one launch for all parameters)
# ----------------------------------------------------------------------------
def _ema_kernel(s_ref, p_ref, o_ref, *, one_minus_decay):
    # Compute in f32 (robust even if params are ever bf16), cast on store.
    s = s_ref[...].astype(jnp.float32)
    p = p_ref[...].astype(jnp.float32)
    o_ref[...] = (s - one_minus_decay * (s - p)).astype(o_ref.dtype)


def _ema_update_fused(shadow_leaves, param_leaves, *, decay):
    shapes = [l.shape for l in shadow_leaves]
    sizes = [int(l.size) for l in shadow_leaves]

    flat_s = jnp.concatenate([l.reshape(-1) for l in shadow_leaves])
    flat_p = jnp.concatenate([p.reshape(-1) for p in param_leaves])
    n = flat_s.shape[0]

    LANE = 128
    rows = pl.cdiv(n, LANE)
    tr = min(1024, _round_up(rows, 8))          # ~512 KiB f32 per block
    rows_pad = _round_up(rows, tr)
    pad = rows_pad * LANE - n

    s2d = jnp.pad(flat_s, (0, pad)).reshape(rows_pad, LANE)
    p2d = jnp.pad(flat_p, (0, pad)).reshape(rows_pad, LANE)

    out = pl.pallas_call(
        functools.partial(_ema_kernel, one_minus_decay=1.0 - decay),
        out_shape=jax.ShapeDtypeStruct((rows_pad, LANE), flat_s.dtype),
        grid=(rows_pad // tr,),
        in_specs=[
            pl.BlockSpec((tr, LANE), lambda i: (i, 0)),
            pl.BlockSpec((tr, LANE), lambda i: (i, 0)),
        ],
        out_specs=pl.BlockSpec((tr, LANE), lambda i: (i, 0)),
        input_output_aliases={0: 0},  # update shadow slab in place
        compiler_params=pltpu.CompilerParams(
            dimension_semantics=("parallel",),
            vmem_limit_bytes=48 * 1024 * 1024,
        ),
    )(s2d, p2d)

    flat_out = out.reshape(-1)
    new_leaves = []
    off = 0
    for shp, sz in zip(shapes, sizes):
        new_leaves.append(flat_out[off:off + sz].reshape(shp))
        off += sz
    return new_leaves


# ----------------------------------------------------------------------------
# EMA wrapper (plain-Python glue; all hot-path math is in the kernels above)
# ----------------------------------------------------------------------------
class EMA:
    def __init__(self, model_params, decay):
        self.decay = float(decay)
        self.model = dict(model_params)          # {name: array}
        self.shadow = deepcopy(self.model)       # detached copy of the params
        self.training = True
        # Single jitted, fused update (one kernel launch for all parameters).
        self._update_fn = jax.jit(
            functools.partial(_ema_update_fused, decay=self.decay))

    def update(self):
        if not self.training:
            print("EMA update should only be called during training", flush=True)
            return
        assert self.model.keys() == self.shadow.keys()
        names = sorted(self.shadow.keys())
        shadow_leaves = [self.shadow[n] for n in names]
        param_leaves = [self.model[n] for n in names]
        new_leaves = self._update_fn(shadow_leaves, param_leaves)
        self.shadow = {n: v for n, v in zip(names, new_leaves)}
        # TODO(synk): buffer copy-through omitted — the wrapped model has no buffers.

    def __call__(self, x):
        params = self.model if self.training else self.shadow
        return linear_forward(x, params["weight"], params["bias"])


# ----------------------------------------------------------------------------
# Demo
# ----------------------------------------------------------------------------
if __name__ == "__main__":
    key = jax.random.PRNGKey(0)
    k_w, k_b, k_x = jax.random.split(key, 3)

    B, Din, Dout = 8, 32, 32
    decay = 0.99

    # Deterministic parameter init (synthetic; no checkpoint load).
    weight = jax.random.normal(k_w, (Dout, Din), dtype=jnp.float32) * 0.1
    bias = jax.random.normal(k_b, (Dout,), dtype=jnp.float32) * 0.1
    x = jax.random.normal(k_x, (B, Din), dtype=jnp.float32)

    ema = EMA({"weight": weight, "bias": bias}, decay=decay)

    # forward in training mode -> uses model params
    y_train = ema(x)
    jax.block_until_ready(y_train)

    # perturb model params (simulating an optimizer step), then EMA update
    ema.model["weight"] = ema.model["weight"] + 0.01
    ema.model["bias"] = ema.model["bias"] - 0.01
    ema.update()
    jax.block_until_ready(ema.shadow["weight"])

    # forward in eval mode -> uses shadow params
    ema.training = False
    y_eval = ema(x)
    jax.block_until_ready(y_eval)

    # sanity check against pure-JAX reference
    ref_shadow_w = weight - (1.0 - decay) * (weight - (weight + 0.01))
    ref_shadow_b = bias - (1.0 - decay) * (bias - (bias - 0.01))
    ref_eval = x @ ref_shadow_w.T + ref_shadow_b
    ref_train = x @ weight.T + bias
    assert jnp.allclose(ema.shadow["weight"], ref_shadow_w, atol=1e-6)
    assert jnp.allclose(ema.shadow["bias"], ref_shadow_b, atol=1e-6)
    assert jnp.allclose(y_train, ref_train, atol=1e-5)
    assert jnp.allclose(y_eval, ref_eval, atol=1e-5)

    print("KERNEL_OK")
</pallas_src>

<mosaic_0001>
module attributes {stable_mosaic.version = 11 : i64} {
  func.func @_linear_kernel(%arg0: i32, %arg1: i32, %arg2: i32, %arg3: memref<8x128xf32, #tpu.memory_space<vmem>>, %arg4: memref<128x128xf32, #tpu.memory_space<vmem>>, %arg5: memref<1x128xf32, #tpu.memory_space<vmem>>, %arg6: memref<8x128xf32, #tpu.memory_space<vmem>>, %arg7: memref<8x128xf32, #tpu.memory_space<vmem>>) attributes {dimension_semantics = [#tpu.dimension_semantics<parallel>, #tpu.dimension_semantics<parallel>, #tpu.dimension_semantics<arbitrary>], iteration_bounds = array<i64: 1, 1, 1>, scalar_prefetch = 0 : i64, scratch_operands = 1 : i64, tpu.core_type = #tpu.core_type<tc>, window_params = [{transform_indices = @transform_0, window_bounds = array<i64: 8, 128>}, {transform_indices = @transform_1, window_bounds = array<i64: 128, 128>}, {transform_indices = @transform_2, window_bounds = array<i64: 1, 128>}, {transform_indices = @transform_3, window_bounds = array<i64: 8, 128>}]} {
    %c0_i32 = arith.constant 0 : i32
    %0 = arith.cmpi eq, %arg2, %c0_i32 : i32
    %1 = arith.extui %0 : i1 to i32
    %c0_i32_0 = arith.constant 0 : i32
    %2 = arith.cmpi ne, %1, %c0_i32_0 : i32
    scf.if %2 {
      %cst_10 = arith.constant 0.000000e+00 : f32
      %12 = vector.broadcast %cst_10 : f32 to vector<8x128xf32>
      %c0_11 = arith.constant 0 : index
      %c0_12 = arith.constant 0 : index
      %13 = vector.load %arg7[%c0_11, %c0_12] : memref<8x128xf32, #tpu.memory_space<vmem>>, vector<8x128xf32>
      tpu.vector_store %arg7[%c0_11, %c0_12], %12 {strides = array<i32>} : memref<8x128xf32, #tpu.memory_space<vmem>>, vector<8x128xf32>,
    } else {
    }
    %c0 = arith.constant 0 : index
    %c0_1 = arith.constant 0 : index
    %3 = vector.load %arg7[%c0, %c0_1] : memref<8x128xf32, #tpu.memory_space<vmem>>, vector<8x128xf32>
    %c0_2 = arith.constant 0 : index
    %c0_3 = arith.constant 0 : index
    %4 = vector.load %arg3[%c0_2, %c0_3] : memref<8x128xf32, #tpu.memory_space<vmem>>, vector<8x128xf32>
    %c0_4 = arith.constant 0 : index
    %c0_5 = arith.constant 0 : index
    %5 = vector.load %arg4[%c0_4, %c0_5] : memref<128x128xf32, #tpu.memory_space<vmem>>, vector<128x128xf32>
    %cst = arith.constant dense<0.000000e+00> : vector<8x128xf32>
    %6 = tpu.matmul %4, %5, %cst {dimension_numbers = #tpu.dot_dimension_numbers<[1], [1], [0], [0], [0, 0, 1, 0], [], []>} : vector<8x128xf32>, vector<128x128xf32>, vector<8x128xf32> -> vector<8x128xf32>
    %7 = arith.addf %3, %6 : vector<8x128xf32>
    %c0_6 = arith.constant 0 : index
    %c0_7 = arith.constant 0 : index
    %8 = vector.load %arg7[%c0_6, %c0_7] : memref<8x128xf32, #tpu.memory_space<vmem>>, vector<8x128xf32>
    tpu.vector_store %arg7[%c0_6, %c0_7], %7 {strides = array<i32>} : memref<8x128xf32, #tpu.memory_space<vmem>>, vector<8x128xf32>,
    %c0_i32_8 = arith.constant 0 : i32
    %9 = arith.cmpi eq, %arg2, %c0_i32_8 : i32
    %10 = arith.extui %9 : i1 to i32
    %c0_i32_9 = arith.constant 0 : i32
    %11 = arith.cmpi ne, %10, %c0_i32_9 : i32
    scf.if %11 {
      %c0_10 = arith.constant 0 : index
      %c0_11 = arith.constant 0 : index
      %12 = vector.load %arg7[%c0_10, %c0_11] : memref<8x128xf32, #tpu.memory_space<vmem>>, vector<8x128xf32>
      %c0_12 = arith.constant 0 : index
      %c0_13 = arith.constant 0 : index
      %13 = vector.load %arg5[%c0_12, %c0_13] : memref<1x128xf32, #tpu.memory_space<vmem>>, vector<1x128xf32>
      %14 = vector.broadcast %13 : vector<1x128xf32> to vector<8x128xf32>
      %15 = arith.addf %12, %14 : vector<8x128xf32>
      %c0_14 = arith.constant 0 : index
      %c0_15 = arith.constant 0 : index
      %16 = vector.load %arg6[%c0_14, %c0_15] : memref<8x128xf32, #tpu.memory_space<vmem>>, vector<8x128xf32>
      tpu.vector_store %arg6[%c0_14, %c0_15], %15 {strides = array<i32>} : memref<8x128xf32, #tpu.memory_space<vmem>>, vector<8x128xf32>,
    } else {
    }
    return
  }
  func.func @transform_0(%arg0: i32, %arg1: i32, %arg2: i32) -> (i32, i32) {
    %c0_i32 = arith.constant 0 : i32
    return %arg0, %arg2 : i32, i32
  }
  func.func @transform_1(%arg0: i32, %arg1: i32, %arg2: i32) -> (i32, i32) {
    %c0_i32 = arith.constant 0 : i32
    return %arg1, %arg2 : i32, i32
  }
  func.func @transform_2(%arg0: i32, %arg1: i32, %arg2: i32) -> (i32, i32) {
    %c0_i32 = arith.constant 0 : i32
    %c0_i32_0 = arith.constant 0 : i32
    return %c0_i32, %arg1 : i32, i32
  }
  func.func @transform_3(%arg0: i32, %arg1: i32, %arg2: i32) -> (i32, i32) {
    %c0_i32 = arith.constant 0 : i32
    return %arg0, %arg1 : i32, i32
  }
}

</mosaic_0001>

<bundles_post_ra>
// kernel: _linear_forward_impl.1
= control target key start
LH: loop header
LB: loop body
LE: loop exit
PB: predicated region body
PF: predicated region fallthrough
CT: control target
= control target key end

     0   :  { %v242_v2 = vmov 0.0|0.0   ;;  %vm243_vm0 = vmmov 0   ;;  %v244_v4 = vmov 0.0   ;;  %s332_s0 = inlined_call_operand.vmem [shape: f32[8,128], index: 0, kind: input, shape index: {}]   ;;  %s333_s1 = inlined_call_operand.vmem [shape: f32[128,128], index: 1, kind: input, shape index: {}]   ;;  %s334_s2 = inlined_call_operand.vmem [shape: f32[1,128], index: 2, kind: input, shape index: {}]   ;;  %s335_s3 = inlined_call_operand.hbm [shape: f32[8,128], index: 3, kind: output, shape index: {}]  }
   0x1   :  { %v22_v0 = vld [vmem:[%s333_s1] sm:$0xff]  ;;  %v23_v1 = vld [vmem:[%s333_s1 + $0x8] sm:$0xff]  ;;  %190 = vmatprep.subr.bf16.mxu0 %v242_v2  ;;  %187 = vmatprep.mubr.msk.f32.mxu0 %vm243_vm0, %v244_v4  ;;  %v24_v5 = vld [vmem:[%s333_s1 + $0x10] sm:$0xff] }
   0x2   :  { %v191_v3 = vpack.c.bf16 %v23_v1, %v22_v0  ;;  %v25_v6 = vld [vmem:[%s333_s1 + $0x18] sm:$0xff] }
   0x4   :  { %192 = vmatpush3.bf16.xpose.msra.mxu0 %v191_v3 }
   0x5   :  { %193 = vmatprep.subr.bf16.mxu0 %v242_v2 }
   0x6   :  { %8 = vsyncpa [#allocation4], 0  ;;  %v194_v7 = vpack.c.bf16 %v25_v6, %v24_v5  ;;  %v26_v8 = vld [vmem:[%s333_s1 + $0x20] sm:$0xff]  ;;  %v27_v9 = vld [vmem:[%s333_s1 + $0x28] sm:$0xff]  ;;  %s245_s21 = smov [#allocation3]  }
   0x7   :  { %v197_v10 = vpack.c.bf16 %v27_v9, %v26_v8  ;;  %v28_v11 = vld [vmem:[%s333_s1 + $0x30] sm:$0xff]  ;;  %v29_v12 = vld [vmem:[%s333_s1 + $0x38] sm:$0xff]  ;;  %v30_v14 = vld [vmem:[%s333_s1 + $0x40] sm:$0xff]  ;;  %s129_s22 = sshll.u32 %s245_s21, 4  ;;  %s130_s22 = int_to_ptr.vmem [resolvable:$true] %s129_s22 }
   0x8   :  { %v200_v13 = vpack.c.bf16 %v29_v12, %v28_v11  ;;  %v31_v15 = vld [vmem:[%s333_s1 + $0x48] sm:$0xff]  ;;  %v32_v17 = vld [vmem:[%s333_s1 + $0x50] sm:$0xff]  ;;  %v33_v18 = vld [vmem:[%s333_s1 + $0x58] sm:$0xff]  ;;  %s218_s23 = scalar_lea.vmem %s130_s22, 128  ;;  %p223_p1 = scmp.lt.s32.totalorder %s130_s22, %s130_s22 }
   0x9   :  { %v203_v16 = vpack.c.bf16 %v31_v15, %v30_v14  ;;  %v206_v19 = vpack.c.bf16 %v33_v18, %v32_v17  ;;  %v34_v20 = vld [vmem:[%s333_s1 + $0x60] sm:$0xff]  ;;  %v35_v21 = vld [vmem:[%s333_s1 + $0x68] sm:$0xff]  ;;  %v36_v23 = vld [vmem:[%s333_s1 + $0x70] sm:$0xff]  ;;  %p219_p0 = scmp.ne.s32.totalorder %s130_s22, %s218_s23  ;;  %p224_p2 = scmp.lt.s32.totalorder %s218_s23, %s218_s23 }
   0xa   :  { %v209_v22 = vpack.c.bf16 %v35_v21, %v34_v20  ;;  %v37_v24 = vld [vmem:[%s333_s1 + $0x78] sm:$0xff]  ;;  %v21_v26 = vld [vmem:[%s332_s0] sm:$0xff] }
   0xb   :  { %v212_v25 = vpack.c.bf16 %v37_v24, %v36_v23  ;;  %v137_v27 = vld [vmem:[%s334_s2] ss:$0 sm:$0xff]  ;;  %p225_p3 = por %p224_p2, %p223_p1 }
   0xc   :  { %195 = vmatpush3.bf16.xpose.msra.mxu0 %v194_v7 }
   0xd   :  { %196 = vmatprep.subr.bf16.mxu0 %v242_v2  ;;  %p226_p4 = pnand %p225_p3, %p219_p0 }
  0x14   :  { %198 = vmatpush3.bf16.xpose.msra.mxu0 %v197_v10 }
  0x15   :  { %199 = vmatprep.subr.bf16.mxu0 %v242_v2 }
  0x1c   :  { %201 = vmatpush3.bf16.xpose.msra.mxu0 %v200_v13 }
  0x1d   :  { %202 = vmatprep.subr.bf16.mxu0 %v242_v2 }
  0x24   :  { %204 = vmatpush3.bf16.xpose.msra.mxu0 %v203_v16 }
  0x25   :  { %205 = vmatprep.subr.bf16.mxu0 %v242_v2 }
  0x2c   :  { %207 = vmatpush3.bf16.xpose.msra.mxu0 %v206_v19 }
  0x2d   :  { %208 = vmatprep.subr.bf16.mxu0 %v242_v2 }
  0x34   :  { %210 = vmatpush3.bf16.xpose.msra.mxu0 %v209_v22 }
  0x35   :  { %211 = vmatprep.subr.bf16.mxu0 %v242_v2 }
  0x3c   :  { %213 = vmatpush3.bf16.xpose.msra.mxu0 %v212_v25 }
  0x43   :  { %188 = vmatmul.mubr.f32.vlgmr.msra.gmra.mrb[0].mxu0 %v21_v26 }
 0x116   :  { %v104_v28 = vpop.f32.mrb[0].mxu0 }
 0x117   :  { %v121_v29 = vadd.f32 %v137_v27, %v104_v28  ;;  %v189_v30 = vpop.f32.mrb[1].mxu0 }
 0x119   :  { %122 = vst [vmem:[#allocation3] sm:$0xff] %v121_v29 }
 0x11a   :  { %229 = shalt.err (!%p226_p4)
}
 0x11b   :  { %s230_s24 = scalar_lea.hbm %s335_s3, 128 }
 0x11c   :  { %p231_p5 = scmp.ne.s32.totalorder %s335_s3, %s230_s24  ;;  %p234_p6 = scmp.lt.u32.totalorder %s230_s24, %s335_s3 }
 0x11e   :  { %p236_p7 = pnand %p234_p6, %p231_p5 }
 0x120   :  { %239 = shalt.err (!%p236_p7)
}
 0x121   :  { %132 = dma.vmem_to_hbm [thread:$0]  %s130_s22, 128, %s335_s3, [#allocation4]  }
 0x122   :  { %240 = dma.done.wait [#allocation4], 128  }
 0x123   :  { %241 = vsyncadd [#allocation4], 4294967168 }
 0x124   :  { %136 = vsyncpa [#allocation4], 1 }

</bundles_post_ra>
